<compile_context>
chip_gen: v7x
topology: tpu7x:2x2x1
jax: 0.10.0
libtpu: 0.0.40
codegen_flags: <defaults>
</compile_context>

<pallas_src>
import functools

import jax
import jax.numpy as jnp
from jax.experimental import pallas as pl
from jax.experimental.pallas import tpu as pltpu

BN_EPS = 1e-5        # PyTorch BatchNorm3d default eps
LEAKY_SLOPE = 0.1    # LeakyReLU(0.1)


def _ca_kernel(x_ref, w1_ref, b1_ref, w2_ref, b2_ref, o_ref):
    """Block = (Tb, C*V, HW): pool -> folded/expanded 1x1-conv MLP -> sigmoid gate -> scale."""
    x = x_ref[...]                                    # (Tb, CV, HW)
    # AdaptiveAvgPool3d((V,1,1)) with D == V: mean over the spatial (lane) axis.
    pooled = jnp.mean(x, axis=-1)                     # (Tb, CV)   — XLU cross-lane reduce
    # Conv3d(C -> Cr, k=1) + BN, view-expanded: (Tb, CV) @ (CV, Cr*V)
    z = jnp.dot(pooled, w1_ref[...], preferred_element_type=jnp.float32) + b1_ref[...]
    z = jnp.where(z > 0, z, LEAKY_SLOPE * z)          # LeakyReLU(0.1)
    # Conv3d(Cr -> C, k=1) + BN, view-expanded: (Tb, Cr*V) @ (Cr*V, CV)
    g = jnp.dot(z, w2_ref[...], preferred_element_type=jnp.float32) + b2_ref[...]
    scale = jax.nn.sigmoid(g).astype(x.dtype)         # (Tb, CV) — EUP exp + recip
    o_ref[...] = (x * scale[:, :, None]).astype(o_ref.dtype)   # gate broadcast over H*W


def _fold_bn(params):
    """Fold frozen (eval-mode) BatchNorm3d into the 1x1 conv weights/biases."""
    s1 = params["g1"] * jax.lax.rsqrt(params["rv1"] + BN_EPS)          # (Cr,)
    w1 = params["w1"] * s1[:, None]                                    # (Cr, C)
    b1 = (params["b1"] - params["rm1"]) * s1 + params["be1"]           # (Cr,)
    s2 = params["g2"] * jax.lax.rsqrt(params["rv2"] + BN_EPS)          # (C,)
    w2 = params["w2"] * s2[:, None]                                    # (C, Cr)
    b2 = (params["b2"] - params["rm2"]) * s2 + params["be2"]           # (C,)
    return w1, b1, w2, b2


def _expand_over_views(w1, b1, w2, b2, num_views):
    """Expand the per-channel 1x1 convs so they act on the flattened (C*V) axis.

    With rows indexed c*V+v, kron(W^T, I_V) applies W independently per view,
    so the whole gate MLP becomes two plain 2-D matmuls inside the kernel.
    """
    eye_v = jnp.eye(num_views, dtype=w1.dtype)
    w1e = jnp.kron(w1.T, eye_v)                 # (C*V, Cr*V)
    w2e = jnp.kron(w2.T, eye_v)                 # (Cr*V, C*V)
    b1e = jnp.repeat(b1, num_views)[None, :]    # (1, Cr*V)
    b2e = jnp.repeat(b2, num_views)[None, :]    # (1, C*V)
    return w1e, b1e, w2e, b2e


def _choose_block_n(n, slice_bytes, target_bytes=3 << 20):
    """Largest divisor of n with block <= target bytes, keeping >= 2 grid steps
    when n >= 2 (so v7x's two TensorCores both get work)."""
    best = 1
    for tb in range(1, n + 1):
        if n % tb:
            continue
        if tb * slice_bytes > target_bytes:
            continue
        if n > 1 and n // tb < 2:
            continue
        best = tb
    return best


def _full_spec(shape):
    nd = len(shape)
    return pl.BlockSpec(shape, lambda i, _nd=nd: (0,) * _nd)


def ca_layer(x, params, num_views=None):
    """x: (N, C, V, H, W) float32 — PyTorch NCDHW with depth D == num_views."""
    N, C, V, H, W = x.shape
    if num_views is not None:
        assert V == num_views, "AdaptiveAvgPool3d((V,1,1)) path assumes input depth == num_views"
    assert C // 16 >= 1, "channel must be >= 16 (C // 16 bottleneck)"
    HW = H * W
    CV = C * V

    # Contiguous merges of (C,V) and (H,W) — no transpose, no extra HBM pass.
    xr = x.reshape(N, CV, HW)

    w1, b1, w2, b2 = _fold_bn(params)
    w1e, b1e, w2e, b2e = _expand_over_views(w1, b1, w2, b2, V)
    param_vals = [w1e, b1e, w2e, b2e]

    slice_bytes = CV * HW * x.dtype.itemsize
    block_n = _choose_block_n(N, slice_bytes)
    grid = (N // block_n,)

    x_spec = pl.BlockSpec((block_n, CV, HW), lambda i: (i, 0, 0))

    # in + out double-buffered blocks + (double-buffered) params + margin.
    param_bytes = sum(int(p.size) * p.dtype.itemsize for p in param_vals)
    vmem_need = 4 * block_n * slice_bytes + 4 * param_bytes + (2 << 20)
    # Only raise the scoped-VMEM limit when a block actually needs it
    # (v5e default is 16 MiB); otherwise keep each generation's default.
    vmem_limit = int(vmem_need) if vmem_need > (16 << 20) else None
    # TODO(synk): if a single (C*V, H*W) slice ever exceeds ~12 MiB, tile the
    # H*W axis with a two-pass pool+scale instead of raising vmem_limit further.

    out = pl.pallas_call(
        _ca_kernel,
        out_shape=jax.ShapeDtypeStruct((N, CV, HW), x.dtype),
        grid_spec=pltpu.PrefetchScalarGridSpec(
            num_scalar_prefetch=0,
            grid=grid,
            in_specs=[x_spec] + [_full_spec(p.shape) for p in param_vals],
            out_specs=x_spec,
        ),
        compiler_params=pltpu.CompilerParams(
            dimension_semantics=("parallel",),
            vmem_limit_bytes=vmem_limit,
        ),
    )(xr, *param_vals)

    return out.reshape(N, C, V, H, W)


def ca_layer_ref(x, params):
    """Pure-JAX reference (PyTorch eval-mode semantics, BN not folded)."""
    def bc(p):  # per-channel vector -> broadcastable over (N, C, V, H, W)
        return p[None, :, None, None, None]

    y = jnp.mean(x, axis=(3, 4), keepdims=True)                           # (N, C, V, 1, 1)
    z = jnp.einsum("ncvhw,oc->novhw", y, params["w1"]) + bc(params["b1"])
    z = (z - bc(params["rm1"])) / jnp.sqrt(bc(params["rv1"]) + BN_EPS)
    z = z * bc(params["g1"]) + bc(params["be1"])
    z = jnp.where(z > 0, z, LEAKY_SLOPE * z)
    z = jnp.einsum("ncvhw,oc->novhw", z, params["w2"]) + bc(params["b2"])
    z = (z - bc(params["rm2"])) / jnp.sqrt(bc(params["rv2"]) + BN_EPS)
    z = z * bc(params["g2"]) + bc(params["be2"])
    return x * jax.nn.sigmoid(z)


def make_params(channel, key):
    """Deterministic synthetic raw parameters matching CALayer.__init__ shapes."""
    cr = channel // 16
    ks = jax.random.split(key, 12)
    f32 = jnp.float32

    w1 = (0.1 * jax.random.normal(ks[0], (cr, channel))).astype(f32)   # Conv3d(C, Cr, 1) weight
    b1 = (0.1 * jax.random.normal(ks[1], (cr,))).astype(f32)
    g1 = (1.0 + 0.1 * jax.random.normal(ks[2], (cr,))).astype(f32)     # BatchNorm3d(Cr)
    be1 = (0.1 * jax.random.normal(ks[3], (cr,))).astype(f32)
    rm1 = (0.1 * jax.random.normal(ks[4], (cr,))).astype(f32)
    rv1 = (1.0 + 0.1 * jnp.abs(jax.random.normal(ks[5], (cr,)))).astype(f32)

    w2 = (0.1 * jax.random.normal(ks[6], (channel, cr))).astype(f32)   # Conv3d(Cr, C, 1) weight
    b2 = (0.1 * jax.random.normal(ks[7], (channel,))).astype(f32)
    g2 = (1.0 + 0.1 * jax.random.normal(ks[8], (channel,))).astype(f32)  # BatchNorm3d(C)
    be2 = (0.1 * jax.random.normal(ks[9], (channel,))).astype(f32)
    rm2 = (0.1 * jax.random.normal(ks[10], (channel,))).astype(f32)
    rv2 = (1.0 + 0.1 * jnp.abs(jax.random.normal(ks[11], (channel,)))).astype(f32)

    return dict(w1=w1, b1=b1, g1=g1, be1=be1, rm1=rm1, rv1=rv1,
                w2=w2, b2=b2, g2=g2, be2=be2, rm2=rm2, rv2=rv2)


if __name__ == "__main__":
    # channel must be >= 16 (C // 16 bottleneck); keep everything small.
    N, C, V, H, W = 2, 32, 4, 16, 16
    key = jax.random.PRNGKey(0)
    kx, kp = jax.random.split(key)

    x = jax.random.normal(kx, (N, C, V, H, W), dtype=jnp.float32)
    params = make_params(C, kp)

    out = jax.block_until_ready(ca_layer(x, params, num_views=V))
    ref = jax.block_until_ready(ca_layer_ref(x, params))

    assert out.shape == x.shape and out.dtype == x.dtype
    err = jnp.max(jnp.abs(out - ref))
    assert jnp.allclose(out, ref, atol=1e-5, rtol=1e-5), f"max abs err {err}"
    print("KERNEL_OK")
</pallas_src>

<mosaic_0001>
module attributes {stable_mosaic.version = 11 : i64} {
  func.func @_ca_kernel(%arg0: i32, %arg1: memref<1x128x256xf32, #tpu.memory_space<vmem>>, %arg2: memref<128x8xf32, #tpu.memory_space<vmem>>, %arg3: memref<1x8xf32, #tpu.memory_space<vmem>>, %arg4: memref<8x128xf32, #tpu.memory_space<vmem>>, %arg5: memref<1x128xf32, #tpu.memory_space<vmem>>, %arg6: memref<1x128x256xf32, #tpu.memory_space<vmem>>) attributes {dimension_semantics = [#tpu.dimension_semantics<parallel>], iteration_bounds = array<i64: 2>, scalar_prefetch = 0 : i64, scratch_operands = 0 : i64, tpu.core_type = #tpu.core_type<tc>, window_params = [{transform_indices = @transform_0, window_bounds = array<i64: 1, 128, 256>}, {pipeline_mode = #tpu.pipeline_mode<synchronous>, transform_indices = @transform_1, window_bounds = array<i64: 128, 8>}, {pipeline_mode = #tpu.pipeline_mode<synchronous>, transform_indices = @transform_2, window_bounds = array<i64: 1, 8>}, {pipeline_mode = #tpu.pipeline_mode<synchronous>, transform_indices = @transform_3, window_bounds = array<i64: 8, 128>}, {pipeline_mode = #tpu.pipeline_mode<synchronous>, transform_indices = @transform_4, window_bounds = array<i64: 1, 128>}, {transform_indices = @transform_5, window_bounds = array<i64: 1, 128, 256>}]} {
    %c0 = arith.constant 0 : index
    %c0_0 = arith.constant 0 : index
    %c0_1 = arith.constant 0 : index
    %0 = vector.load %arg1[%c0, %c0_0, %c0_1] : memref<1x128x256xf32, #tpu.memory_space<vmem>>, vector<1x128x256xf32>
    %cst = arith.constant dense<0.000000e+00> : vector<1x128xf32>
    %1 = vector.multi_reduction <add>, %0, %cst [2] : vector<1x128x256xf32> to vector<1x128xf32>
    %cst_2 = arith.constant 2.560000e+02 : f32
    %2 = vector.broadcast %cst_2 : f32 to vector<1x128xf32>
    %3 = arith.divf %1, %2 : vector<1x128xf32>
    %c0_3 = arith.constant 0 : index
    %c0_4 = arith.constant 0 : index
    %4 = vector.load %arg2[%c0_3, %c0_4] : memref<128x8xf32, #tpu.memory_space<vmem>>, vector<128x8xf32>
    %cst_5 = arith.constant dense<0.000000e+00> : vector<1x8xf32>
    %5 = tpu.matmul %3, %4, %cst_5 {dimension_numbers = #tpu.dot_dimension_numbers<[1], [0], [0], [1], [0, 0, 1, 1], [], []>} : vector<1x128xf32>, vector<128x8xf32>, vector<1x8xf32> -> vector<1x8xf32>
    %c0_6 = arith.constant 0 : index
    %c0_7 = arith.constant 0 : index
    %6 = vector.load %arg3[%c0_6, %c0_7] : memref<1x8xf32, #tpu.memory_space<vmem>>, vector<1x8xf32>
    %7 = arith.addf %5, %6 : vector<1x8xf32>
    %cst_8 = arith.constant 0.000000e+00 : f32
    %8 = vector.broadcast %cst_8 : f32 to vector<1x8xf32>
    %9 = arith.cmpf ogt, %7, %8 : vector<1x8xf32>
    %cst_9 = arith.constant 1.000000e-01 : f32
    %10 = vector.broadcast %cst_9 : f32 to vector<1x8xf32>
    %11 = arith.mulf %10, %7 : vector<1x8xf32>
    %12 = arith.select %9, %7, %11 : vector<1x8xi1>, vector<1x8xf32>
    %c0_10 = arith.constant 0 : index
    %c0_11 = arith.constant 0 : index
    %13 = vector.load %arg4[%c0_10, %c0_11] : memref<8x128xf32, #tpu.memory_space<vmem>>, vector<8x128xf32>
    %cst_12 = arith.constant dense<0.000000e+00> : vector<1x128xf32>
    %14 = tpu.matmul %12, %13, %cst_12 {dimension_numbers = #tpu.dot_dimension_numbers<[1], [0], [0], [1], [0, 0, 1, 1], [], []>} : vector<1x8xf32>, vector<8x128xf32>, vector<1x128xf32> -> vector<1x128xf32>
    %c0_13 = arith.constant 0 : index
    %c0_14 = arith.constant 0 : index
    %15 = vector.load %arg5[%c0_13, %c0_14] : memref<1x128xf32, #tpu.memory_space<vmem>>, vector<1x128xf32>
    %16 = arith.addf %14, %15 : vector<1x128xf32>
    %17 = arith.negf %16 : vector<1x128xf32>
    %18 = math.exp %17 : vector<1x128xf32>
    %cst_15 = arith.constant 1.000000e+00 : f32
    %19 = vector.broadcast %cst_15 : f32 to vector<1x128xf32>
    %20 = arith.addf %19, %18 : vector<1x128xf32>
    %21 = arith.divf %19, %20 : vector<1x128xf32>
    %22 = vector.shape_cast %21 : vector<1x128xf32> to vector<1x128x1xf32>
    %23 = vector.broadcast %22 : vector<1x128x1xf32> to vector<1x128x256xf32>
    %24 = arith.mulf %0, %23 : vector<1x128x256xf32>
    %c0_16 = arith.constant 0 : index
    %c0_17 = arith.constant 0 : index
    %c0_18 = arith.constant 0 : index
    %25 = vector.load %arg6[%c0_16, %c0_17, %c0_18] : memref<1x128x256xf32, #tpu.memory_space<vmem>>, vector<1x128x256xf32>
    tpu.vector_store %arg6[%c0_16, %c0_17, %c0_18], %24 {strides = array<i32>} : memref<1x128x256xf32, #tpu.memory_space<vmem>>, vector<1x128x256xf32>,
    return
  }
  func.func @transform_0(%arg0: i32) -> (i32, i32, i32) {
    %c0_i32 = arith.constant 0 : i32
    %c0_i32_0 = arith.constant 0 : i32
    %c0_i32_1 = arith.constant 0 : i32
    return %arg0, %c0_i32, %c0_i32_0 : i32, i32, i32
  }
  func.func @transform_1(%arg0: i32) -> (i32, i32) {
    %c0_i32 = arith.constant 0 : i32
    %c0_i32_0 = arith.constant 0 : i32
    %c0_i32_1 = arith.constant 0 : i32
    return %c0_i32, %c0_i32_0 : i32, i32
  }
  func.func @transform_2(%arg0: i32) -> (i32, i32) {
    %c0_i32 = arith.constant 0 : i32
    %c0_i32_0 = arith.constant 0 : i32
    %c0_i32_1 = arith.constant 0 : i32
    return %c0_i32, %c0_i32_0 : i32, i32
  }
  func.func @transform_3(%arg0: i32) -> (i32, i32) {
    %c0_i32 = arith.constant 0 : i32
    %c0_i32_0 = arith.constant 0 : i32
    %c0_i32_1 = arith.constant 0 : i32
    return %c0_i32, %c0_i32_0 : i32, i32
  }
  func.func @transform_4(%arg0: i32) -> (i32, i32) {
    %c0_i32 = arith.constant 0 : i32
    %c0_i32_0 = arith.constant 0 : i32
    %c0_i32_1 = arith.constant 0 : i32
    return %c0_i32, %c0_i32_0 : i32, i32
  }
  func.func @transform_5(%arg0: i32) -> (i32, i32, i32) {
    %c0_i32 = arith.constant 0 : i32
    %c0_i32_0 = arith.constant 0 : i32
    %c0_i32_1 = arith.constant 0 : i32
    return %arg0, %c0_i32, %c0_i32_0 : i32, i32, i32
  }
}

</mosaic_0001>

<bundles_post_ra>
// kernel: tpu_custom_call.1
= control target key start
LH: loop header
LB: loop body
LE: loop exit
PB: predicated region body
PF: predicated region fallthrough
CT: control target
= control target key end

     0   :  { %10 = vsyncpa [#allocation3], 0  ;;  %s1611_s0 = inlined_call_operand.hbm [shape: f32[2,128,256], index: 0, kind: input, shape index: {}]   ;;  %s1612_s1 = inlined_call_operand.vmem [shape: f32[128,8], index: 1, kind: input, shape index: {}]   ;;  %s1613_s2 = inlined_call_operand.vmem [shape: f32[1,8], index: 2, kind: input, shape index: {}]   ;;  %s1614_s3 = inlined_call_operand.vmem [shape: f32[8,128], index: 3, kind: input, shape index: {}]   ;;  %s1615_s4 = inlined_call_operand.vmem [shape: f32[1,128], index: 4, kind: input, shape index: {}]   ;;  %s1616_s5 = inlined_call_operand.hbm [shape: f32[2,128,256], index: 5, kind: output, shape index: {}]  }
   0x1   :  { %12 = vsyncpa [#allocation3 + $0x1], 0 }
   0x2   :  { %13 = vsyncpa [#allocation4], 0 }
   0x3   :  { %15 = vsyncpa [#allocation4 + $0x1], 0  ;;  %s1153_s18 = smov 0   ;;  %s1155_s19 = smov 0  }
   0x4   :  { %s1157_s20 = smov 0   ;;  %s1159_s21 = smov 0  }
   0x5 LB: > { %s1174_s22 = sadd.s32 4294967295, %s1112_s21   ;;  %s858_s23 = sadd.s32 4294967294, %s1112_s21   ;;  %s1112_s21 = sphi %s1159_s21, %s1629_s21   ;;  %s1108_s20 = sphi %s1157_s20, %s1628_s20   ;;  %s1104_s19 = sphi %s1155_s19, %s1627_s19   ;;  %s1100_s18 = sphi %s1153_s18, %s1626_s18  }
   0x6   : > { %s1178_s24 = sadd.s32 1, %s1112_s21   ;;  %s28_s25 = sadd.s32 1, %s1108_s20 }
   0x7   : > { %s25_s26 = ssub.s32 %s1112_s21, %s1178_s24  ;;  %p35_p0 = scmp.ne.s32.totalorder %s1108_s20, %s1104_s19 }
   0x8   : > { %p26_p1 = scmp.eq.s32.totalorder %s25_s26, 0  ;;  %p36_p2 = scmp.eq.s32.totalorder %s1112_s21, 0 }
   0x9   : > { %p41_p3 = scmp.ne.s32.totalorder %s1104_s19, %s1100_s18  ;;  %p42_p4 = scmp.eq.s32.totalorder %s1174_s22, 0 }
   0xa   : > { %s1190_s27 = scalar_select %p26_p1, %s1108_s20, %s28_s25  }
   0xb   : > { %p1192_p5 = por %p36_p2, %p35_p0  ;;  %p1196_p6 = por %p42_p4, %p41_p3 }
   0xc   : > { %p149_p7 = scmp.eq.s32.totalorder %s1174_s22, 1  ;;  %p155_p8 = scmp.eq.s32.totalorder %s858_s23, 1 }
   0xd   : > { %p971_p10 = scmp.lt.s32.totalorder %s1112_s21, 2  ;;  %s187_s7 = sand.u32 1, %s1108_s20  }
   0xe   : > { %p1203_p11 = por %p149_p7, %p35_p0  ;;  %p1207_p12 = por %p155_p8, %p41_p3 }
   0xf   : > { %s874_s8 = sshll.u32 %s1112_s21, 12  ;;  %s861_s9 = sshll.u32 %s187_s7, 8 }
  0x10   : > { %s1620_s30 = scalar_select %p1203_p11, 1, 0 }
  0x11   : > { %s1621_s6 = scalar_select %p1207_p12, 1, 0 }
  0x12   : > { %s1216_s12 = scalar_lea.hbm %s1611_s0, %s874_s8  ;;  %s191_s13 = scalar_lea.vmem [#allocation2], %s861_s9 }
  0x13   : > { %s198_s14 = sshll.u32 %s191_s13, 4  ;;  %p1220_p13 = pnand %p971_p10, %p1192_p5  ;;  %s1224_s14 = int_to_ptr.vmem [resolvable:$true] %s198_s14 }
  0x14   : > { %s1226_s16 = scalar_lea.sflag [#allocation3], %s187_s7  ;;  %s1016_s17 = scalar_lea.hbm %s1216_s12, 4096 }
  0x15   : > { %p1017_p0 = scmp.ne.s32.totalorder %s1216_s12, %s1016_s17  ;;  %p1018_p1 = pneg %p1220_p13 }
  0x16   : > { %s1021_s26 = scalar_lea.hbm %s1611_s0, 8192  ;;  %p1022_p4 = scmp.lt.u32.totalorder %s1216_s12, %s1611_s0 }
  0x17   : > { %p1019_p2 = pnand %p1018_p1, %p1017_p0  ;;  %p1023_p5 = scmp.lt.u32.totalorder %s1021_s26, %s1016_s17 }
  0x18   : > { %p1025_p8 = scmp.lt.u32.totalorder %s1016_s17, %s1216_s12 }
  0x19   : > { %p1020_p3 = pneg %p1019_p2  ;;  %p1024_p7 = por %p1023_p5, %p1022_p4 }
  0x1b   : > { %p1026_p10 = por %p1025_p8, %p1024_p7 }
  0x1d   : > { %p1027_p9 = pnand %p1026_p10, %p1020_p3 }
  0x1f   : > { %1030 = shalt.err (!%p1027_p9)
}
  0x20   : > { %s1031_s7 = scalar_lea.vmem %s1224_s14, 4096  ;;  %s1114_s9 = smov [#allocation2]  }
  0x21   : > { %p1032_p0 = scmp.ne.s32.totalorder %s1224_s14, %s1031_s7  ;;  %s1036_s10 = sshll.u32 %s1114_s9, 4  ;;  %s1037_s10 = int_to_ptr.vmem [resolvable:$false] %s1036_s10 }
  0x22   : > { %s1038_s11 = scalar_lea.vmem %s1037_s10, 8192  ;;  %p1039_p11 = scmp.lt.s32.totalorder %s1224_s14, %s1037_s10 }
  0x23   : > { %p1034_p2 = pnand %p1032_p0, %p1018_p1  ;;  %p1040_p4 = scmp.lt.s32.totalorder %s1038_s11, %s1031_s7 }
  0x25   : > { %p1035_p12 = pneg %p1034_p2  ;;  %p1041_p5 = por %p1040_p4, %p1039_p11 }
  0x27   : > { %p1042_p7 = pnand %p1041_p5, %p1035_p12 }
  0x29   : > { %1045 = shalt.err (!%p1042_p7)
}
  0x2a   : > { %s1115_s13 = smov 256   ;;  %s1116_s17 = smov 16  }
  0x2b   : > { %966 = dma.hbm_to_vmem [thread:$0]  (!%p1220_p13), %s1216_s12, 4096, %s1224_s14, %s1226_s16, %s1115_s13, %s1115_s13, %s1116_s17  }
  0x2c   : > { %p864_p9 = scmp.ge.s32.totalorder %s1112_s21, 1  ;;  %p206_p1 = scmp.lt.s32.totalorder %s1112_s21, 3 }
  0x2e   : > { %p207_p3 = pnand %p864_p9, %p206_p1 }
  0x2f   : > { %s1257_s23 = sand.u32 (!%p207_p3), 1, %s1104_s19  }
  0x30   : > { %210 = sbr.rel (%p207_p3) target bundleno = 858 (0x35a), region = 40  ;;  %s865_s25 = sshll.u32 (!%p207_p3), %s1257_s23, 8 }
  0x31   : > { %s213_s26 = scalar_lea.sflag (!%p207_p3), [#allocation3], %s1257_s23  ;;  %s1263_s28 = scalar_lea.vmem (!%p207_p3), [#allocation2], %s865_s25 }
  0x37   : > { %1091 = dma.done.wait (%p1196_p6), %s213_s26, 4096  }
  0x38   : > { %1093 = vsyncadd (%p1196_p6), %s213_s26, 4294963200  ;;  %v1270_v0 = vld [vmem:[%s1263_s28] sm:$0xff]  ;;  %v1273_v1 = vld [vmem:[%s1263_s28 + $0x8] sm:$0xff]  ;;  %v1117_v38 = vmov 0.0|0.0   ;;  %vm1118_vm0 = vmmov 0   ;;  %vm384_vm1 = vcmask 130112  }
  0x39   : > { %v1276_v2 = vld [vmem:[%s1263_s28 + $0x20] sm:$0xff]  ;;  %v275_v3 = vadd.f32 %v1273_v1, %v1270_v0  ;;  %v1281_v4 = vld [vmem:[%s1263_s28 + $0x28] sm:$0xff]  ;;  %v1284_v5 = vld [vmem:[%s1263_s28 + $0x10] sm:$0xff]  ;;  %935 = vmatprep.subr.bf16.mxu0 %v1117_v38  ;;  %vm391_vm2 = vcmask 195712   ;;  %vm398_vm3 = vcmask 261312   ;;  %vm405_vm4 = vcmask 326912  }
  0x3a   : > { %v1287_v6 = vld [vmem:[%s1263_s28 + $0x18] sm:$0xff]  ;;  %v281_v7 = vadd.f32 %v1281_v4, %v1276_v2  ;;  %v1292_v8 = vld [vmem:[%s1263_s28 + $0x30] sm:$0xff]  ;;  %v1302_v12 = vld [vmem:[%s1263_s28 + $0x40] sm:$0xff]  ;;  %vm412_vm5 = vcmask 392512   ;;  %vm419_vm6 = vcmask 458112   ;;  %vm426_vm7 = vcmask 523712  }
  0x3b   : > { %v1295_v9 = vld [vmem:[%s1263_s28 + $0x38] sm:$0xff]  ;;  %276 = vadd.xlane.f32.xlu0 %v275_v3  ;;  %v278_v10 = vadd.f32 %v1287_v6, %v1284_v5  ;;  %v1305_v13 = vld [vmem:[%s1263_s28 + $0x48] sm:$0xff]  ;;  %v1308_v14 = vld [vmem:[%s1263_s28 + $0x50] sm:$0xff]  ;;  %vm433_vm8 = vcmask 589312   ;;  %vm440_vm9 = vcmask 654912   ;;  %vm447_vm10 = vcmask 720512  }
  0x3c   : > { %282 = vadd.xlane.f32.xlu1 %v281_v7  ;;  %v284_v11 = vadd.f32 %v1295_v9, %v1292_v8  ;;  %v1311_v15 = vld [vmem:[%s1263_s28 + $0x58] sm:$0xff]  ;;  %v287_v16 = vadd.f32 %v1305_v13, %v1302_v12  ;;  %v1318_v18 = vld [vmem:[%s1263_s28 + $0x60] sm:$0xff]  ;;  %v1321_v19 = vld [vmem:[%s1263_s28 + $0x68] sm:$0xff]  ;;  %vm454_vm11 = vcmask 786112   ;;  %vm461_vm12 = vcmask 851712   ;;  %s1498_s13 = scalar_lea.vmem [#allocation5], %s865_s25 }
  0x3d   : > { %v290_v17 = vadd.f32 %v1311_v15, %v1308_v14  ;;  %v1324_v20 = vld [vmem:[%s1263_s28 + $0x70] sm:$0xff]  ;;  %v1327_v21 = vld [vmem:[%s1263_s28 + $0x78] sm:$0xff]  ;;  %v293_v22 = vadd.f32 %v1321_v19, %v1318_v18  ;;  %v1334_v24 = vld [vmem:[%s1263_s28 + $0x80] sm:$0xff]  ;;  %vm468_vm13 = vcmask 917312   ;;  %vm475_vm14 = vcmask 982912   ;;  %s875_s25 = sshll.u32 %s1174_s22, 12 }
  0x3e   : > { %v296_v23 = vadd.f32 %v1327_v21, %v1324_v20  ;;  %v1337_v25 = vld [vmem:[%s1263_s28 + $0x88] sm:$0xff]  ;;  %v1340_v26 = vld [vmem:[%s1263_s28 + $0x90] sm:$0xff]  ;;  %v1343_v27 = vld [vmem:[%s1263_s28 + $0x98] sm:$0xff]  ;;  %vm482_vm15 = vcmask 1048512   ;;  %s785_s17 = sshll.u32 %s1498_s13, 4  ;;  %s1561_s29 = scalar_lea.hbm %s1616_s5, %s875_s25  ;;  %s1563_s17 = int_to_ptr.vmem [resolvable:$true] %s785_s17 }
  0x3f   : > { %279 = vadd.xlane.f32.xlu0 %v278_v10  ;;  %v299_v28 = vadd.f32 %v1337_v25, %v1334_v24  ;;  %v302_v29 = vadd.f32 %v1343_v27, %v1340_v26  ;;  %v1350_v30 = vld [vmem:[%s1263_s28 + $0xa0] sm:$0xff]  ;;  %v1353_v31 = vld [vmem:[%s1263_s28 + $0xa8] sm:$0xff]  ;;  %v1356_v32 = vld [vmem:[%s1263_s28 + $0xb0] sm:$0xff]  ;;  %s772_s22 = scalar_lea.sflag [#allocation4], %s1257_s23  ;;  %s1046_s12 = scalar_lea.vmem %s1563_s17, 4096 }
  0x40   : > { %285 = vadd.xlane.f32.xlu1 %v284_v11  ;;  %v1359_v33 = vld [vmem:[%s1263_s28 + $0xb8] sm:$0xff]  ;;  %v340_v34 = vld [vmem:[%s1612_s1] sm:$0xff]  ;;  %v341_v35 = vld [vmem:[%s1612_s1 + $0x8] sm:$0xff]  ;;  %v305_v37 = vadd.f32 %v1353_v31, %v1350_v30  ;;  %p1047_p6 = scmp.ne.s32.totalorder %s1563_s17, %s1046_s12  ;;  %p1623_p11 = scmp.ne.s32.totalorder %s1620_s30, 0 }
  0x41   : > { %v936_v36 = vpack.c.bf16 %v341_v35, %v340_v34  ;;  %v308_v39 = vadd.f32 %v1359_v33, %v1356_v32  ;;  %v1372_v40 = vld [vmem:[%s1263_s28 + $0xc0] sm:$0xff]  ;;  %v1375_v41 = vld [vmem:[%s1263_s28 + $0xc8] sm:$0xff]  ;;  %v1378_v42 = vld [vmem:[%s1263_s28 + $0xd0] sm:$0xff]  ;;  %v373_v34 = vlaneseq  ;;  %s1120_s14 = smov [#allocation5]  }
  0x42   : > { %v1381_v43 = vld [vmem:[%s1263_s28 + $0xd8] sm:$0xff]  ;;  %v342_v44 = vld [vmem:[%s1612_s1 + $0x10] sm:$0xff]  ;;  %v311_v47 = vadd.f32 %v1375_v41, %v1372_v40  ;;  %v1394_v49 = vld [vmem:[%s1263_s28 + $0xe0] sm:$0xff]  ;;  %p1048_p12 = pnand %p1047_p6, %p1623_p11  ;;  %s1050_s15 = sshll.u32 %s1120_s14, 4  ;;  %s1051_s15 = int_to_ptr.vmem [resolvable:$false] %s1050_s15 }
  0x43   : > { %288 = vadd.xlane.f32.xlu0 %v287_v16  ;;  %937 = vmatpush3.bf16.msra.mxu0 %v936_v36  ;;  %v343_v45 = vld [vmem:[%s1612_s1 + $0x18] sm:$0xff]  ;;  %v314_v48 = vadd.f32 %v1381_v43, %v1378_v42  ;;  %v1397_v50 = vld [vmem:[%s1263_s28 + $0xe8] sm:$0xff]  ;;  %v1400_v51 = vld [vmem:[%s1263_s28 + $0xf0] sm:$0xff]  ;;  %v1445_v35 = vand.u32 127, %v373_v34  ;;  %v1447_v36 = vshrl.u32 %v373_v34, 7  ;;  %s1052_s16 = scalar_lea.vmem %s1051_s15, 8192  ;;  %p1053_p8 = scmp.lt.s32.totalorder %s1563_s17, %s1051_s15 }
  0x44   : > { %291 = vadd.xlane.f32.xlu1 %v290_v17  ;;  %938 = vmatprep.subr.bf16.mxu0 %v1117_v38  ;;  %v939_v46 = vpack.c.bf16 %v343_v45, %v342_v44  ;;  %v1403_v52 = vld [vmem:[%s1263_s28 + $0xf8] sm:$0xff]  ;;  %v344_v53 = vld [vmem:[%s1612_s1 + $0x20] sm:$0xff]  ;;  %v345_v54 = vld [vmem:[%s1612_s1 + $0x28] sm:$0xff]  ;;  %v317_v56 = vadd.f32 %v1397_v50, %v1394_v49  ;;  %p1049_p13 = pneg %p1048_p12  ;;  %p1054_p10 = scmp.lt.s32.totalorder %s1052_s16, %s1046_s12 }
  0x45   : > { %v942_v55 = vpack.c.bf16 %v345_v54, %v344_v53  ;;  %v320_v57 = vadd.f32 %v1403_v52, %v1400_v51  ;;  %v346_v58 = vld [vmem:[%s1612_s1 + $0x30] sm:$0xff]  ;;  %v347_v59 = vld [vmem:[%s1612_s1 + $0x38] sm:$0xff]  ;;  %v348_v61 = vld [vmem:[%s1612_s1 + $0x40] sm:$0xff]  ;;  %v393_v44 = vadd.s32 4294967272, %v1445_v35  ;;  %v400_v53 = vadd.s32 4294967264, %v1445_v35 }
  0x46   : > { %v945_v60 = vpack.c.bf16 %v347_v59, %v346_v58  ;;  %v349_v62 = vld [vmem:[%s1612_s1 + $0x48] sm:$0xff]  ;;  %v350_v3 = vld [vmem:[%s1612_s1 + $0x50] sm:$0xff]  ;;  %v351_v7 = vld [vmem:[%s1612_s1 + $0x58] sm:$0xff]  ;;  %v407_v58 = vadd.s32 4294967256, %v1445_v35  ;;  %p1055_p0 = por %p1054_p10, %p1053_p8 }
  0x47   : > { %294 = vadd.xlane.f32.xlu0 %v293_v22  ;;  %940 = vmatpush3.bf16.msra.mxu0 %v939_v46  ;;  %v948_v63 = vpack.c.bf16 %v349_v62, %v348_v61  ;;  %v951_v10 = vpack.c.bf16 %v351_v7, %v350_v3  ;;  %v352_v11 = vld [vmem:[%s1612_s1 + $0x60] sm:$0xff]  ;;  %v353_v16 = vld [vmem:[%s1612_s1 + $0x68] sm:$0xff]  ;;  %v354_v22 = vld [vmem:[%s1612_s1 + $0x70] sm:$0xff]  ;;  %v377_v46 = vsub.s32 %v1445_v35, %v1447_v36  ;;  %v414_v7 = vadd.s32 4294967248, %v1445_v35 }
  0x48   : > { %297 = vadd.xlane.f32.xlu1 %v296_v23  ;;  %941 = vmatprep.subr.bf16.mxu0 %v1117_v38  ;;  %v954_v17 = vpack.c.bf16 %v353_v16, %v352_v11  ;;  %v355_v23 = vld [vmem:[%s1612_s1 + $0x78] sm:$0xff]  ;;  %v403_v3 = vsub.s32 %v400_v53, %v1447_v36  ;;  %v435_v53 = vadd.s32 4294967224, %v1445_v35  ;;  %p1056_p2 = pnand %p1055_p0, %p1049_p13 }
  0x4b   : > { %300 = vadd.xlane.f32.xlu0 %v299_v28  ;;  %943 = vmatpush3.bf16.msra.mxu0 %v942_v55  ;;  %v957_v28 = vpack.c.bf16 %v355_v23, %v354_v22  ;;  %v421_v22 = vadd.s32 4294967240, %v1445_v35 }
  0x4c   : > { %303 = vadd.xlane.f32.xlu1 %v302_v29  ;;  %944 = vmatprep.subr.bf16.mxu0 %v1117_v38  ;;  %v1119_v29 = vmov 0.0  }
  0x4d   : > { %927 = vmatprep.mubr.msk.f32.mxu0 %vm1118_vm0, %v1119_v29  ;;  %930 = vmatprep.subr.mxu1 %v1119_v29 }
  0x4e   : > { %932 = vmatprep.mubr.msk.f32.mxu1 %vm1118_vm0, %v1119_v29 }
  0x4f   : > { %306 = vadd.xlane.f32.xlu0 %v305_v37  ;;  %946 = vmatpush3.bf16.msra.mxu0 %v945_v60  ;;  %v379_v37 = vadd.s32 4294967288, %v1445_v35 }
  0x50   : > { %309 = vadd.xlane.f32.xlu1 %v308_v39  ;;  %947 = vmatprep.subr.bf16.mxu0 %v1117_v38  ;;  %v386_v39 = vadd.s32 4294967280, %v1445_v35 }
  0x52   : > { %v389_v54 = vsub.s32 %v386_v39, %v1447_v36 }
  0x53   : > { %312 = vadd.xlane.f32.xlu0 %v311_v47  ;;  %949 = vmatpush3.bf16.msra.mxu0 %v948_v63 }
  0x54   : > { %315 = vadd.xlane.f32.xlu1 %v314_v48  ;;  %950 = vmatprep.subr.bf16.mxu0 %v1117_v38  ;;  %v382_v48 = vsub.s32 %v379_v37, %v1447_v36 }
  0x57   : > { %318 = vadd.xlane.f32.xlu0 %v317_v56  ;;  %952 = vmatpush3.bf16.msra.mxu0 %v951_v10 }
  0x58   : > { %321 = vadd.xlane.f32.xlu1 %v320_v57  ;;  %953 = vmatprep.subr.bf16.mxu0 %v1117_v38  ;;  %v396_v57 = vsub.s32 %v393_v44, %v1447_v36  ;;  %v417_v44 = vsub.s32 %v414_v7, %v1447_v36  ;;  %v449_v7 = vadd.s32 4294967208, %v1445_v35 }
  0x5b   : > { %955 = vmatpush3.bf16.msra.mxu0 %v954_v17  ;;  %v410_v17 = vsub.s32 %v407_v58, %v1447_v36 }
  0x5c   : > { %956 = vmatprep.subr.bf16.mxu0 %v1117_v38 }
  0x5f   : > { %958 = vmatpush3.bf16.msra.mxu0 %v957_v28 }
  0xc8   : > { %v277_v38 = vpop.xlane.xlu0 %276 }
  0xc9   : > { %v283_v45 = vpop.xlane.xlu1 %282  ;;  %v324_v47 = vmul.f32 0.00390625, %v277_v38 }
  0xca   : > { %v326_v55 = vmul.f32 0.00390625, %v283_v45  ;;  %v428_v45 = vadd.s32 4294967232, %v1445_v35 }
  0xcb   : > { %v378_v62 = vrot.slane %v324_v47, %v377_v46 }
  0xcc   : > { %v280_v56 = vpop.xlane.xlu0 %279  ;;  %v390_v10 = vrot.slane %v326_v55, %v389_v54 }
  0xcd   : > { %v325_v59 = vmul.f32 0.00390625, %v280_v56  ;;  %v286_v60 = vpop.xlane.xlu1 %285 }
  0xce   : > { %v327_v61 = vmul.f32 0.00390625, %v286_v60  ;;  %v442_v60 = vadd.s32 4294967216, %v1445_v35 }
  0xcf   : > { %v383_v63 = vrot.slane %v325_v59, %v382_v48  ;;  %v424_v48 = vsub.s32 %v421_v22, %v1447_v36  ;;  %v431_v59 = vsub.s32 %v428_v45, %v1447_v36 }
  0xd0   : > { %v397_v11 = vrot.slane %v327_v61, %v396_v57  ;;  %v289_v16 = vpop.xlane.xlu0 %288 }
  0xd1   : > { %v385_v23 = vsel %vm384_vm1, %v383_v63, %v378_v62  ;;  %v328_v28 = vmul.f32 0.00390625, %v289_v16  ;;  %v292_v29 = vpop.xlane.xlu1 %291  ;;  %vm560_vm1 = vcmask 64512  }
  0xd2   : > { %v392_v34 = vsel %vm391_vm2, %v390_v10, %v385_v23  ;;  %v329_v37 = vmul.f32 0.00390625, %v292_v29  ;;  %v445_v23 = vsub.s32 %v442_v60, %v1447_v36 }
  0xd3   : > { %v399_v38 = vsel %vm398_vm3, %v397_v11, %v392_v34  ;;  %v404_v39 = vrot.slane %v328_v28, %v403_v3  ;;  %v438_v3 = vsub.s32 %v435_v53, %v1447_v36  ;;  %v456_v28 = vadd.s32 4294967200, %v1445_v35 }
  0xd4   : > { %v411_v46 = vrot.slane %v329_v37, %v410_v17  ;;  %v295_v47 = vpop.xlane.xlu0 %294 }
  0xd5   : > { %v406_v54 = vsel %vm405_vm4, %v404_v39, %v399_v38  ;;  %v330_v55 = vmul.f32 0.00390625, %v295_v47  ;;  %v298_v56 = vpop.xlane.xlu1 %297  ;;  %v452_v38 = vsub.s32 %v449_v7, %v1447_v36  ;;  %v463_v39 = vadd.s32 4294967192, %v1445_v35 }
  0xd6   : > { %v331_v57 = vmul.f32 0.00390625, %v298_v56  ;;  %v413_v61 = vsel %vm412_vm5, %v411_v46, %v406_v54  ;;  %v459_v53 = vsub.s32 %v456_v28, %v1447_v36  ;;  %v470_v54 = vadd.s32 4294967184, %v1445_v35 }
  0xd7   : > { %v418_v58 = vrot.slane %v330_v55, %v417_v44 }
  0xd8   : > { %v425_v62 = vrot.slane %v331_v57, %v424_v48  ;;  %v301_v63 = vpop.xlane.xlu0 %300  ;;  %v473_v7 = vsub.s32 %v470_v54, %v1447_v36 }
  0xd9   : > { %v420_v10 = vsel %vm419_vm6, %v418_v58, %v413_v61  ;;  %v332_v11 = vmul.f32 0.00390625, %v301_v63  ;;  %v304_v16 = vpop.xlane.xlu1 %303  ;;  %v466_v58 = vsub.s32 %v463_v39, %v1447_v36 }
  0xda   : > { %v333_v17 = vmul.f32 0.00390625, %v304_v16  ;;  %v427_v29 = vsel %vm426_vm7, %v425_v62, %v420_v10 }
  0xdb   : > { %v432_v22 = vrot.slane %v332_v11, %v431_v59  ;;  %v477_v59 = vadd.s32 4294967176, %v1445_v35 }
  0xdc   : > { %v439_v34 = vrot.slane %v333_v17, %v438_v3  ;;  %v307_v37 = vpop.xlane.xlu0 %306 }
  0xdd   : > { %v434_v44 = vsel %vm433_vm8, %v432_v22, %v427_v29  ;;  %v334_v45 = vmul.f32 0.00390625, %v307_v37  ;;  %v310_v46 = vpop.xlane.xlu1 %309  ;;  %v480_v17 = vsub.s32 %v477_v59, %v1447_v36 }
  0xde   : > { %v335_v47 = vmul.f32 0.00390625, %v310_v46  ;;  %v441_v55 = vsel %vm440_vm9, %v439_v34, %v434_v44  ;;  %v558_v44 = vld [vmem:[%s1614_s3] sm:$0xff] }
  0xdf   : > { %v446_v48 = vrot.slane %v334_v45, %v445_v23  ;;  %931 = vmatpush3.msra.mxu1 %v558_v44  ;;  %v356_v45 = vld [vmem:[%s1613_s2] sm:$0x1] }
  0xe0   : > { %v453_v56 = vrot.slane %v335_v47, %v452_v38  ;;  %v313_v57 = vpop.xlane.xlu0 %312 }
  0xe1   : > { %v448_v60 = vsel %vm447_vm10, %v446_v48, %v441_v55  ;;  %v336_v61 = vmul.f32 0.00390625, %v313_v57  ;;  %v316_v62 = vpop.xlane.xlu1 %315  ;;  %v559_v55 = vld [vmem:[%s1615_s4] sm:$0x1] }
  0xe2   : > { %v337_v63 = vmul.f32 0.00390625, %v316_v62  ;;  %v455_v10 = vsel %vm454_vm11, %v453_v56, %v448_v60  ;;  %v642_v62 = vsub.s32 0, %v1447_v36 }
  0xe3   : > { %v460_v3 = vrot.slane %v336_v61, %v459_v53 }
  0xe4   : > { %v467_v11 = vrot.slane %v337_v63, %v466_v58  ;;  %v319_v16 = vpop.xlane.xlu0 %318 }
  0xe5   : > { %v462_v22 = vsel %vm461_vm12, %v460_v3, %v455_v10  ;;  %v338_v23 = vmul.f32 0.00390625, %v319_v16  ;;  %v322_v28 = vpop.xlane.xlu1 %321 }
  0xe6   : > { %v339_v29 = vmul.f32 0.00390625, %v322_v28  ;;  %v469_v37 = vsel %vm468_vm13, %v467_v11, %v462_v22 }
  0xe7   : > { %v474_v35 = vrot.slane %v338_v23, %v473_v7 }
  0xe8   : > { %v481_v34 = vrot.slane %v339_v29, %v480_v17 }
  0xe9   : > { %v476_v38 = vsel %vm475_vm14, %v474_v35, %v469_v37 }
  0xea   : > { %v483_v39 = vsel %vm482_vm15, %v481_v34, %v476_v38 }
  0xeb   : > { %928 = vmatmul.mubr.f32.vlgmr.msra.gmra.mrb[0].mxu0 %v483_v39 }
 0x1be   : > { %v551_v46 = vpop.f32.mrb[0].mxu0 }
 0x1bf   : > { %v552_v47 = vadd.f32 %v551_v46, %v356_v45  ;;  %v929_v48 = vpop.f32.mrb[1].mxu0 }
 0x1c1   : > { %vm555_vm0 = vcmp.gt.f32.partialorder %v552_v47, 0.0  ;;  %v556_v53 = vmul.f32 0.1, %v552_v47 }
 0x1c3   : > { %v557_v54 = vsel %vm555_vm0, %v552_v47, %v556_v53 }
 0x1c4   : > { %933 = vmatmul.mubr.msk.f32.vlgmr.msra.gmra.mrb[0].mxu1 %vm560_vm1, %v557_v54 }
 0x297   : > { %v630_v56 = vpop.f32.mrb[0].mxu1 }
 0x298   : > { %v631_v57 = vadd.f32 %v630_v56, %v559_v55  ;;  %v934_v58 = vpop.f32.mrb[1].mxu1 }
 0x29a   : > { %v868_v59 = vmul.f32 -1.442695, %v631_v57 }
 0x29c   : > { %1012 = vpow2.f32 %v868_v59 }
 0x2a6   : > { %v1013_v60 = vpop.eup %1012 }
 0x2a7   : > { %v637_v61 = vadd.f32 1.0, %v1013_v60 }
 0x2a9   : > { %1014 = vrcp.f32 %v637_v61 }
 0x2b3   : > { %v1015_v63 = vpop.eup %1014 }
 0x2b4   : > { %v643_v3 = vrot.slane %v1015_v63, %v642_v62 }
 0x2b6   : > { %649 = vbcast.lane.b32.xlu1 %v643_v3, 264  ;;  %645 = vbcast.lane.b32.xlu0 %v643_v3, 256 }
 0x2ba   : > { %653 = vbcast.lane.b32.xlu1 %v643_v3, 272  ;;  %661 = vbcast.lane.b32.xlu0 %v643_v3, 288 }
 0x2be   : > { %657 = vbcast.lane.b32.xlu1 %v643_v3, 280  ;;  %669 = vbcast.lane.b32.xlu0 %v643_v3, 304 }
 0x2c2   : > { %665 = vbcast.lane.b32.xlu1 %v643_v3, 296  ;;  %677 = vbcast.lane.b32.xlu0 %v643_v3, 320 }
 0x2c6   : > { %673 = vbcast.lane.b32.xlu1 %v643_v3, 312  ;;  %685 = vbcast.lane.b32.xlu0 %v643_v3, 336 }
 0x2ca   : > { %681 = vbcast.lane.b32.xlu1 %v643_v3, 328  ;;  %693 = vbcast.lane.b32.xlu0 %v643_v3, 352 }
 0x2ce   : > { %689 = vbcast.lane.b32.xlu1 %v643_v3, 344  ;;  %701 = vbcast.lane.b32.xlu0 %v643_v3, 368 }
 0x2d2   : > { %697 = vbcast.lane.b32.xlu1 %v643_v3, 360 }
 0x2d6   : > { %705 = vbcast.lane.b32.xlu1 %v643_v3, 376 }
 0x328   : > { %v650_v36 = vpop.permute.xlu1 %649  ;;  %v646_v7 = vpop.permute.xlu0 %645 }
 0x329   : > { %v709_v10 = vmul.f32 %v650_v36, %v1284_v5  ;;  %v710_v11 = vmul.f32 %v650_v36, %v1287_v6  ;;  %v707_v16 = vmul.f32 %v646_v7, %v1270_v0  ;;  %v708_v17 = vmul.f32 %v646_v7, %v1273_v1 }
 0x32b   : > { %741 = vst [vmem:[%s1498_s13 + $0x10] sm:$0xff] %v709_v10  ;;  %742 = vst [vmem:[%s1498_s13 + $0x18] sm:$0xff] %v710_v11 }
 0x32c   : > { %739 = vst [vmem:[%s1498_s13] sm:$0xff] %v707_v16  ;;  %740 = vst [vmem:[%s1498_s13 + $0x8] sm:$0xff] %v708_v17  ;;  %v654_v5 = vpop.permute.xlu1 %653  ;;  %v662_v0 = vpop.permute.xlu0 %661 }
 0x32d   : > { %v711_v1 = vmul.f32 %v654_v5, %v1276_v2  ;;  %v712_v6 = vmul.f32 %v654_v5, %v1281_v4  ;;  %v715_v22 = vmul.f32 %v662_v0, %v1302_v12  ;;  %v716_v23 = vmul.f32 %v662_v0, %v1305_v13 }
 0x32f   : > { %743 = vst [vmem:[%s1498_s13 + $0x20] sm:$0xff] %v711_v1  ;;  %744 = vst [vmem:[%s1498_s13 + $0x28] sm:$0xff] %v712_v6 }
 0x330   : > { %747 = vst [vmem:[%s1498_s13 + $0x40] sm:$0xff] %v715_v22  ;;  %748 = vst [vmem:[%s1498_s13 + $0x48] sm:$0xff] %v716_v23  ;;  %v658_v28 = vpop.permute.xlu1 %657  ;;  %v670_v29 = vpop.permute.xlu0 %669 }
 0x331   : > { %v713_v35 = vmul.f32 %v658_v28, %v1292_v8  ;;  %v714_v2 = vmul.f32 %v658_v28, %v1295_v9  ;;  %v719_v4 = vmul.f32 %v670_v29, %v1318_v18  ;;  %v720_v12 = vmul.f32 %v670_v29, %v1321_v19 }
 0x333   : > { %745 = vst [vmem:[%s1498_s13 + $0x30] sm:$0xff] %v713_v35  ;;  %746 = vst [vmem:[%s1498_s13 + $0x38] sm:$0xff] %v714_v2 }
 0x334   : > { %751 = vst [vmem:[%s1498_s13 + $0x60] sm:$0xff] %v719_v4  ;;  %752 = vst [vmem:[%s1498_s13 + $0x68] sm:$0xff] %v720_v12  ;;  %v666_v13 = vpop.permute.xlu1 %665  ;;  %v678_v34 = vpop.permute.xlu0 %677 }
 0x335   : > { %v717_v37 = vmul.f32 %v666_v13, %v1308_v14  ;;  %v718_v8 = vmul.f32 %v666_v13, %v1311_v15  ;;  %v723_v9 = vmul.f32 %v678_v34, %v1334_v24  ;;  %v724_v18 = vmul.f32 %v678_v34, %v1337_v25 }
 0x337   : > { %749 = vst [vmem:[%s1498_s13 + $0x50] sm:$0xff] %v717_v37  ;;  %750 = vst [vmem:[%s1498_s13 + $0x58] sm:$0xff] %v718_v8 }
 0x338   : > { %755 = vst [vmem:[%s1498_s13 + $0x80] sm:$0xff] %v723_v9  ;;  %756 = vst [vmem:[%s1498_s13 + $0x88] sm:$0xff] %v724_v18  ;;  %v674_v19 = vpop.permute.xlu1 %673  ;;  %v686_v38 = vpop.permute.xlu0 %685 }
 0x339   : > { %v721_v39 = vmul.f32 %v674_v19, %v1324_v20  ;;  %v722_v14 = vmul.f32 %v674_v19, %v1327_v21  ;;  %v727_v15 = vmul.f32 %v686_v38, %v1350_v30  ;;  %v728_v24 = vmul.f32 %v686_v38, %v1353_v31 }
 0x33b   : > { %753 = vst [vmem:[%s1498_s13 + $0x70] sm:$0xff] %v721_v39  ;;  %754 = vst [vmem:[%s1498_s13 + $0x78] sm:$0xff] %v722_v14 }
 0x33c   : > { %759 = vst [vmem:[%s1498_s13 + $0xa0] sm:$0xff] %v727_v15  ;;  %760 = vst [vmem:[%s1498_s13 + $0xa8] sm:$0xff] %v728_v24  ;;  %v682_v25 = vpop.permute.xlu1 %681  ;;  %v694_v44 = vpop.permute.xlu0 %693 }
 0x33d   : > { %v725_v45 = vmul.f32 %v682_v25, %v1340_v26  ;;  %v726_v20 = vmul.f32 %v682_v25, %v1343_v27  ;;  %v731_v21 = vmul.f32 %v694_v44, %v1372_v40  ;;  %v732_v30 = vmul.f32 %v694_v44, %v1375_v41 }
 0x33f   : > { %757 = vst [vmem:[%s1498_s13 + $0x90] sm:$0xff] %v725_v45  ;;  %758 = vst [vmem:[%s1498_s13 + $0x98] sm:$0xff] %v726_v20 }
 0x340   : > { %763 = vst [vmem:[%s1498_s13 + $0xc0] sm:$0xff] %v731_v21  ;;  %764 = vst [vmem:[%s1498_s13 + $0xc8] sm:$0xff] %v732_v30  ;;  %v690_v31 = vpop.permute.xlu1 %689  ;;  %v702_v46 = vpop.permute.xlu0 %701 }
 0x341   : > { %v729_v26 = vmul.f32 %v690_v31, %v1356_v32  ;;  %v730_v47 = vmul.f32 %v690_v31, %v1359_v33  ;;  %v735_v27 = vmul.f32 %v702_v46, %v1394_v49  ;;  %v736_v40 = vmul.f32 %v702_v46, %v1397_v50 }
 0x343   : > { %761 = vst [vmem:[%s1498_s13 + $0xb0] sm:$0xff] %v729_v26  ;;  %762 = vst [vmem:[%s1498_s13 + $0xb8] sm:$0xff] %v730_v47 }
 0x344   : > { %767 = vst [vmem:[%s1498_s13 + $0xe0] sm:$0xff] %v735_v27  ;;  %768 = vst [vmem:[%s1498_s13 + $0xe8] sm:$0xff] %v736_v40  ;;  %v698_v41 = vpop.permute.xlu1 %697 }
 0x345   : > { %v733_v48 = vmul.f32 %v698_v41, %v1378_v42  ;;  %v734_v53 = vmul.f32 %v698_v41, %v1381_v43 }
 0x347   : > { %765 = vst [vmem:[%s1498_s13 + $0xd0] sm:$0xff] %v733_v48  ;;  %766 = vst [vmem:[%s1498_s13 + $0xd8] sm:$0xff] %v734_v53 }
 0x348   : > { %v706_v32 = vpop.permute.xlu1 %705 }
 0x349   : > { %v737_v33 = vmul.f32 %v706_v32, %v1400_v51  ;;  %v738_v42 = vmul.f32 %v706_v32, %v1403_v52 }
 0x34b   : > { %769 = vst [vmem:[%s1498_s13 + $0xf0] sm:$0xff] %v737_v33  ;;  %770 = vst [vmem:[%s1498_s13 + $0xf8] sm:$0xff] %v738_v42 }
 0x34c   : > { %1059 = shalt.err (!%p1056_p2)
}
 0x34d   : > { %s1060_s8 = scalar_lea.hbm %s1561_s29, 4096  ;;  %s1064_s10 = scalar_lea.hbm %s1616_s5, 8192 }
 0x34e   : > { %p1061_p4 = scmp.ne.s32.totalorder %s1561_s29, %s1060_s8  ;;  %p1065_p9 = scmp.lt.u32.totalorder %s1561_s29, %s1616_s5 }
 0x34f   : > { %p1066_p1 = scmp.lt.u32.totalorder %s1064_s10, %s1060_s8  ;;  %p1068_p6 = scmp.lt.u32.totalorder %s1060_s8, %s1561_s29 }
 0x350   : > { %p1062_p5 = pnand %p1061_p4, %p1623_p11 }
 0x351   : > { %p1067_p3 = por %p1066_p1, %p1065_p9 }
 0x352   : > { %p1063_p7 = pneg %p1062_p5 }
 0x353   : > { %p1069_p12 = por %p1068_p6, %p1067_p3 }
 0x355   : > { %p1070_p13 = pnand %p1069_p12, %p1063_p7 }
 0x357   : > { %1073 = shalt.err (!%p1070_p13)
}
 0x358   : > { %s1121_s25 = smov 256   ;;  %s1122_s26 = smov 16  }
 0x359   : > { %961 = dma.vmem_to_hbm [thread:$0]  (%p1623_p11), %s1563_s17, 4096, %s1561_s29, %s772_s22, %s1121_s25, %s1121_s25, %s1122_s26  }
 0x35a PF: > { %s800_s28 = sand.u32 1, %s1100_s18   ;;  %p1624_p8 = scmp.ne.s32.totalorder %s1621_s6, 0 }
 0x35b   : > { %p1625_p10 = scmp.ge.s32.totalorder %s1112_s21, 2  ;;  %s801_s12 = scalar_lea.sflag [#allocation4], %s800_s28 }
 0x35d   : > { %p968_p0 = pnand %p1625_p10, %p1624_p8 }
 0x35f   : > { %1095 = dma.done.wait (!%p968_p0), %s801_s12, 4096  }
 0x360   : > { %1097 = vsyncadd (!%p968_p0), %s801_s12, 4294963200  ;;  %p18_p2 = scmp.ge.s32.totalorder %s1178_s24, 4   ;;  %s1626_s18 = smov %s1104_s19 }
 0x361   : > { %s1627_s19 = smov %s1108_s20  ;;  %s1628_s20 = smov %s1190_s27 }
 0x362   : > { %s1629_s21 = smov %s1178_s24  ;;  %20 = sbr.rel (!%p18_p2) target bundleno = 5 (0x5), region = 85 }
 0x369   :  { %806 = vsyncpa [#allocation3], 1 }
 0x36a   :  { %808 = vsyncpa [#allocation3 + $0x1], 1 }
 0x36b   :  { %809 = vsyncpa [#allocation4], 1 }
 0x36c   :  { %811 = vsyncpa [#allocation4 + $0x1], 1 }

</bundles_post_ra>
